<compile_context>
chip_gen: v5e
topology: v5e:2x2
jax: 0.10.0
libtpu: 0.0.40
codegen_flags: <defaults>
</compile_context>

<pallas_src>
import jax
import jax.numpy as jnp
from jax.experimental import pallas as pl
from jax.experimental.pallas import tpu as pltpu


def _round_up(x, m):
    return (x + m - 1) // m * m


def cnn_block_forward(x_nchw, weight, gamma, beta, running_mean, running_var,
                      *, stride=1, padding=1, eps=1e-5):
    """Fused Conv2d(bias=False) + BatchNorm2d(eval) + LeakyReLU(0.1)."""
    N, Cin, H, W = x_nchw.shape
    Cout, _, KH, KW = weight.shape

    Hp, Wp = H + 2 * padding, W + 2 * padding
    Hof, Wof = Hp - KH + 1, Wp - KW + 1          # stride-1 output extents
    T = KH * KW
    Cinp = _round_up(Cin, 8)                     # tile-aligned channel slab per tap
    Coutp = _round_up(Cout, 8)                   # sublane-aligned output channels
    Kc = T * Cinp                                # folded contraction depth
    Mp = _round_up(Hof * Wp, 128)                # lane-dense spatial output columns
    max_off = (KH - 1) * Wp + (KW - 1)
    R = _round_up(max_off + Mp, 128)             # flat input length + tap slack
    # Note: Mp includes KW-1 wrap-around columns per row plus 128-padding; they
    # read only zero-padded input, are finite, and are sliced off below.

    # ---- wrapper-side prep (O(input) + O(weights); no HBM im2col) ----
    # NCHW, zero-pad channels Cin->Cinp and space to (Hp, Wp), then flatten the
    # padded spatial grid onto the LAST (lane) axis: block layout (Cinp, R).
    x = jnp.pad(x_nchw, ((0, 0), (0, Cinp - Cin),
                         (padding, padding), (padding, padding)))
    x = x.reshape(N, Cinp, Hp * Wp)
    x = jnp.pad(x, ((0, 0), (0, 0), (0, R - Hp * Wp))).astype(jnp.bfloat16)

    # Weights: (Cout, Cin, KH, KW) -> (Coutp, T*Cinp).  Contraction index is
    # tap-major / channel-minor to match the in-kernel gather.  Kept UNSCALED in
    # bf16; the f32 BN scale is applied in the epilogue (accuracy, ~free).
    w = jnp.transpose(weight, (2, 3, 1, 0))                        # (KH,KW,Cin,Cout)
    w = jnp.pad(w, ((0, 0), (0, 0), (0, Cinp - Cin), (0, Coutp - Cout)))
    w = w.reshape(Kc, Coutp).T.astype(jnp.bfloat16)                # (Coutp, Kc)

    inv_std = 1.0 / jnp.sqrt(running_var + eps)
    scale = jnp.pad((gamma * inv_std).astype(jnp.float32), (0, Coutp - Cout))
    shift = jnp.pad((beta - running_mean * gamma * inv_std).astype(jnp.float32),
                    (0, Coutp - Cout))
    scale = scale.reshape(Coutp, 1)
    shift = shift.reshape(Coutp, 1)

    def kernel(x_ref, w_ref, scale_ref, shift_ref, o_ref, rhs_ref):
        # Gather the KH*KW taps into one (T*Cinp, Mp) RHS: tap t's patch matrix
        # for ALL stride-1 output pixels is the contiguous lane slice
        # [off_t, off_t + Mp) of the flat image, so each copy is a full
        # (Cinp=8, Mp) tile-aligned store into the f32 scratch.
        for t in range(T):
            off = (t // KW) * Wp + (t % KW)                  # static tap offset
            rhs_ref[t * Cinp:(t + 1) * Cinp, :] = (
                x_ref[0, :, off:off + Mp].astype(jnp.float32))
        # ONE MXU contraction of depth T*Cinp instead of T tiny K=Cin dots.
        acc = jnp.dot(w_ref[...], rhs_ref[...].astype(jnp.bfloat16),
                      preferred_element_type=jnp.float32)    # (Coutp, Mp) f32
        y = acc * scale_ref[...] + shift_ref[...]            # eval-mode BN, f32
        o_ref[0] = jnp.maximum(y, 0.1 * y).astype(o_ref.dtype)   # LeakyReLU(0.1)

    out = pl.pallas_call(
        kernel,
        # bf16 writeback (halves HBM stores); wrapper casts back to f32.
        out_shape=jax.ShapeDtypeStruct((N, Coutp, Mp), jnp.bfloat16),
        grid_spec=pltpu.PrefetchScalarGridSpec(
            num_scalar_prefetch=0,
            grid=(N,),
            in_specs=[
                pl.BlockSpec((1, Cinp, R), lambda n: (n, 0, 0)),
                # Grid-invariant operands (constant index_map => not re-DMA'd).
                # At production Cin/Cout also mark them pipeline_mode=pl.Buffered(1)
                # to drop their second VMEM buffer (matters under v7x's 64 MiB VMEM).
                pl.BlockSpec((Coutp, Kc), lambda n: (0, 0)),
                pl.BlockSpec((Coutp, 1), lambda n: (0, 0)),
                pl.BlockSpec((Coutp, 1), lambda n: (0, 0)),
            ],
            out_specs=pl.BlockSpec((1, Coutp, Mp), lambda n: (n, 0, 0)),
            # f32 scratch keeps every tap store (8,128)-tile aligned; cast to
            # bf16 right at the MXU.
            scratch_shapes=[pltpu.VMEM((Kc, Mp), jnp.float32)],
        ),
        compiler_params=pltpu.CompilerParams(
            dimension_semantics=("parallel",)),
        # TODO(synk): for realistic shapes (H*W and Cout in the hundreds) add a
        # row-band grid axis and a 256-wide Cout-tile axis (v6e/v7x MXU) with a
        # VMEM f32 accumulator, and set vmem_limit_bytes explicitly.
    )(x, w, scale, shift)

    # Drop wrap-around columns / padded channels; layout is already channel-major.
    out = out[:, :Cout, :Hof * Wp].astype(jnp.float32)
    out = out.reshape(N, Cout, Hof, Wp)
    # TODO(synk): for stride>1, do the striding in-kernel (strided row slices)
    # instead of computing all stride-1 outputs and slicing here.
    return out[:, :, ::stride, :Wof:stride]


def _reference(x_nchw, weight, gamma, beta, running_mean, running_var,
               *, stride=1, padding=1, eps=1e-5):
    y = jax.lax.conv_general_dilated(
        x_nchw, weight, (stride, stride),
        ((padding, padding), (padding, padding)),
        dimension_numbers=("NCHW", "OIHW", "NCHW"))
    inv_std = 1.0 / jnp.sqrt(running_var + eps)
    scale = (gamma * inv_std).reshape(1, -1, 1, 1)
    shift = (beta - running_mean * gamma * inv_std).reshape(1, -1, 1, 1)
    y = y * scale + shift
    return jnp.where(y >= 0, y, 0.1 * y)


if __name__ == "__main__":
    # CNNBlock(in_channels=4, out_channels=8, kernel_size=3, padding=1), bn_act=True
    N, Cin, H, W = 2, 4, 16, 16
    Cout, KH, KW = 8, 3, 3

    key = jax.random.PRNGKey(0)
    kx, kw, kg, kb, km, kv = jax.random.split(key, 6)

    x = jax.random.normal(kx, (N, Cin, H, W), dtype=jnp.float32)
    weight = jax.random.normal(kw, (Cout, Cin, KH, KW), dtype=jnp.float32) * 0.1
    gamma = 1.0 + 0.1 * jax.random.normal(kg, (Cout,), dtype=jnp.float32)
    beta = 0.1 * jax.random.normal(kb, (Cout,), dtype=jnp.float32)
    running_mean = 0.1 * jax.random.normal(km, (Cout,), dtype=jnp.float32)
    running_var = 1.0 + 0.1 * jax.random.uniform(kv, (Cout,), dtype=jnp.float32)

    out = cnn_block_forward(x, weight, gamma, beta, running_mean, running_var)
    out = jax.block_until_ready(out)

    ref = _reference(x, weight, gamma, beta, running_mean, running_var)
    assert out.shape == (N, Cout, H, W)
    # bf16 MXU inputs + bf16 writeback -> widened tolerance vs. full-f32 reference.
    assert jnp.allclose(out, ref, atol=5e-2, rtol=5e-2), \
        float(jnp.max(jnp.abs(out - ref)))

    print("KERNEL_OK")
</pallas_src>

<mosaic_0001>
module attributes {stable_mosaic.version = 11 : i64} {
  func.func @kernel(%arg0: i32, %arg1: memref<1x8x512xbf16, #tpu.memory_space<vmem>>, %arg2: memref<8x72xbf16, #tpu.memory_space<vmem>>, %arg3: memref<8x1xf32, #tpu.memory_space<vmem>>, %arg4: memref<8x1xf32, #tpu.memory_space<vmem>>, %arg5: memref<1x8x384xbf16, #tpu.memory_space<vmem>>, %arg6: memref<72x384xf32, #tpu.memory_space<vmem>>) attributes {dimension_semantics = [#tpu.dimension_semantics<parallel>], iteration_bounds = array<i64: 2>, scalar_prefetch = 0 : i64, scratch_operands = 1 : i64, tpu.core_type = #tpu.core_type<tc>, window_params = [{transform_indices = @transform_0, window_bounds = array<i64: 1, 8, 512>}, {pipeline_mode = #tpu.pipeline_mode<synchronous>, transform_indices = @transform_1, window_bounds = array<i64: 8, 72>}, {pipeline_mode = #tpu.pipeline_mode<synchronous>, transform_indices = @transform_2, window_bounds = array<i64: 8, 1>}, {pipeline_mode = #tpu.pipeline_mode<synchronous>, transform_indices = @transform_3, window_bounds = array<i64: 8, 1>}, {transform_indices = @transform_4, window_bounds = array<i64: 1, 8, 384>}]} {
    %c0 = arith.constant 0 : index
    %c0_0 = arith.constant 0 : index
    %c0_1 = arith.constant 0 : index
    %0 = vector.load %arg1[%c0, %c0_0, %c0_1] : memref<1x8x512xbf16, #tpu.memory_space<vmem>>, vector<1x8x384xbf16>
    %1 = vector.shape_cast %0 : vector<1x8x384xbf16> to vector<8x384xbf16>
    %2 = arith.extf %1 : vector<8x384xbf16> to vector<8x384xf32>
    %c0_2 = arith.constant 0 : index
    %c0_3 = arith.constant 0 : index
    %3 = vector.load %arg6[%c0_2, %c0_3] : memref<72x384xf32, #tpu.memory_space<vmem>>, vector<8x384xf32>
    tpu.vector_store %arg6[%c0_2, %c0_3], %2 {strides = array<i32>} : memref<72x384xf32, #tpu.memory_space<vmem>>, vector<8x384xf32>,
    %c0_4 = arith.constant 0 : index
    %c0_5 = arith.constant 0 : index
    %c1 = arith.constant 1 : index
    %4 = vector.load %arg1[%c0_4, %c0_5, %c1] : memref<1x8x512xbf16, #tpu.memory_space<vmem>>, vector<1x8x384xbf16>
    %5 = vector.shape_cast %4 : vector<1x8x384xbf16> to vector<8x384xbf16>
    %6 = arith.extf %5 : vector<8x384xbf16> to vector<8x384xf32>
    %c8 = arith.constant 8 : index
    %c0_6 = arith.constant 0 : index
    %7 = vector.load %arg6[%c8, %c0_6] : memref<72x384xf32, #tpu.memory_space<vmem>>, vector<8x384xf32>
    tpu.vector_store %arg6[%c8, %c0_6], %6 {strides = array<i32>} : memref<72x384xf32, #tpu.memory_space<vmem>>, vector<8x384xf32>,
    %c0_7 = arith.constant 0 : index
    %c0_8 = arith.constant 0 : index
    %c2 = arith.constant 2 : index
    %8 = vector.load %arg1[%c0_7, %c0_8, %c2] : memref<1x8x512xbf16, #tpu.memory_space<vmem>>, vector<1x8x384xbf16>
    %9 = vector.shape_cast %8 : vector<1x8x384xbf16> to vector<8x384xbf16>
    %10 = arith.extf %9 : vector<8x384xbf16> to vector<8x384xf32>
    %c16 = arith.constant 16 : index
    %c0_9 = arith.constant 0 : index
    %11 = vector.load %arg6[%c16, %c0_9] : memref<72x384xf32, #tpu.memory_space<vmem>>, vector<8x384xf32>
    tpu.vector_store %arg6[%c16, %c0_9], %10 {strides = array<i32>} : memref<72x384xf32, #tpu.memory_space<vmem>>, vector<8x384xf32>,
    %c0_10 = arith.constant 0 : index
    %c0_11 = arith.constant 0 : index
    %c18 = arith.constant 18 : index
    %12 = vector.load %arg1[%c0_10, %c0_11, %c18] : memref<1x8x512xbf16, #tpu.memory_space<vmem>>, vector<1x8x384xbf16>
    %13 = vector.shape_cast %12 : vector<1x8x384xbf16> to vector<8x384xbf16>
    %14 = arith.extf %13 : vector<8x384xbf16> to vector<8x384xf32>
    %c24 = arith.constant 24 : index
    %c0_12 = arith.constant 0 : index
    %15 = vector.load %arg6[%c24, %c0_12] : memref<72x384xf32, #tpu.memory_space<vmem>>, vector<8x384xf32>
    tpu.vector_store %arg6[%c24, %c0_12], %14 {strides = array<i32>} : memref<72x384xf32, #tpu.memory_space<vmem>>, vector<8x384xf32>,
    %c0_13 = arith.constant 0 : index
    %c0_14 = arith.constant 0 : index
    %c19 = arith.constant 19 : index
    %16 = vector.load %arg1[%c0_13, %c0_14, %c19] : memref<1x8x512xbf16, #tpu.memory_space<vmem>>, vector<1x8x384xbf16>
    %17 = vector.shape_cast %16 : vector<1x8x384xbf16> to vector<8x384xbf16>
    %18 = arith.extf %17 : vector<8x384xbf16> to vector<8x384xf32>
    %c32 = arith.constant 32 : index
    %c0_15 = arith.constant 0 : index
    %19 = vector.load %arg6[%c32, %c0_15] : memref<72x384xf32, #tpu.memory_space<vmem>>, vector<8x384xf32>
    tpu.vector_store %arg6[%c32, %c0_15], %18 {strides = array<i32>} : memref<72x384xf32, #tpu.memory_space<vmem>>, vector<8x384xf32>,
    %c0_16 = arith.constant 0 : index
    %c0_17 = arith.constant 0 : index
    %c20 = arith.constant 20 : index
    %20 = vector.load %arg1[%c0_16, %c0_17, %c20] : memref<1x8x512xbf16, #tpu.memory_space<vmem>>, vector<1x8x384xbf16>
    %21 = vector.shape_cast %20 : vector<1x8x384xbf16> to vector<8x384xbf16>
    %22 = arith.extf %21 : vector<8x384xbf16> to vector<8x384xf32>
    %c40 = arith.constant 40 : index
    %c0_18 = arith.constant 0 : index
    %23 = vector.load %arg6[%c40, %c0_18] : memref<72x384xf32, #tpu.memory_space<vmem>>, vector<8x384xf32>
    tpu.vector_store %arg6[%c40, %c0_18], %22 {strides = array<i32>} : memref<72x384xf32, #tpu.memory_space<vmem>>, vector<8x384xf32>,
    %c0_19 = arith.constant 0 : index
    %c0_20 = arith.constant 0 : index
    %c36 = arith.constant 36 : index
    %24 = vector.load %arg1[%c0_19, %c0_20, %c36] : memref<1x8x512xbf16, #tpu.memory_space<vmem>>, vector<1x8x384xbf16>
    %25 = vector.shape_cast %24 : vector<1x8x384xbf16> to vector<8x384xbf16>
    %26 = arith.extf %25 : vector<8x384xbf16> to vector<8x384xf32>
    %c48 = arith.constant 48 : index
    %c0_21 = arith.constant 0 : index
    %27 = vector.load %arg6[%c48, %c0_21] : memref<72x384xf32, #tpu.memory_space<vmem>>, vector<8x384xf32>
    tpu.vector_store %arg6[%c48, %c0_21], %26 {strides = array<i32>} : memref<72x384xf32, #tpu.memory_space<vmem>>, vector<8x384xf32>,
    %c0_22 = arith.constant 0 : index
    %c0_23 = arith.constant 0 : index
    %c37 = arith.constant 37 : index
    %28 = vector.load %arg1[%c0_22, %c0_23, %c37] : memref<1x8x512xbf16, #tpu.memory_space<vmem>>, vector<1x8x384xbf16>
    %29 = vector.shape_cast %28 : vector<1x8x384xbf16> to vector<8x384xbf16>
    %30 = arith.extf %29 : vector<8x384xbf16> to vector<8x384xf32>
    %c56 = arith.constant 56 : index
    %c0_24 = arith.constant 0 : index
    %31 = vector.load %arg6[%c56, %c0_24] : memref<72x384xf32, #tpu.memory_space<vmem>>, vector<8x384xf32>
    tpu.vector_store %arg6[%c56, %c0_24], %30 {strides = array<i32>} : memref<72x384xf32, #tpu.memory_space<vmem>>, vector<8x384xf32>,
    %c0_25 = arith.constant 0 : index
    %c0_26 = arith.constant 0 : index
    %c38 = arith.constant 38 : index
    %32 = vector.load %arg1[%c0_25, %c0_26, %c38] : memref<1x8x512xbf16, #tpu.memory_space<vmem>>, vector<1x8x384xbf16>
    %33 = vector.shape_cast %32 : vector<1x8x384xbf16> to vector<8x384xbf16>
    %34 = arith.extf %33 : vector<8x384xbf16> to vector<8x384xf32>
    %c64 = arith.constant 64 : index
    %c0_27 = arith.constant 0 : index
    %35 = vector.load %arg6[%c64, %c0_27] : memref<72x384xf32, #tpu.memory_space<vmem>>, vector<8x384xf32>
    tpu.vector_store %arg6[%c64, %c0_27], %34 {strides = array<i32>} : memref<72x384xf32, #tpu.memory_space<vmem>>, vector<8x384xf32>,
    %c0_28 = arith.constant 0 : index
    %c0_29 = arith.constant 0 : index
    %36 = vector.load %arg2[%c0_28, %c0_29] : memref<8x72xbf16, #tpu.memory_space<vmem>>, vector<8x72xbf16>
    %c0_30 = arith.constant 0 : index
    %c0_31 = arith.constant 0 : index
    %37 = vector.load %arg6[%c0_30, %c0_31] : memref<72x384xf32, #tpu.memory_space<vmem>>, vector<72x384xf32>
    %38 = arith.truncf %37 : vector<72x384xf32> to vector<72x384xbf16>
    %cst = arith.constant dense<0.000000e+00> : vector<8x384xf32>
    %39 = tpu.matmul %36, %38, %cst {dimension_numbers = #tpu.dot_dimension_numbers<[1], [0], [0], [1], [0, 0, 1, 1], [], []>} : vector<8x72xbf16>, vector<72x384xbf16>, vector<8x384xf32> -> vector<8x384xf32>
    %c0_32 = arith.constant 0 : index
    %c0_33 = arith.constant 0 : index
    %40 = vector.load %arg3[%c0_32, %c0_33] : memref<8x1xf32, #tpu.memory_space<vmem>>, vector<8x1xf32>
    %41 = vector.broadcast %40 : vector<8x1xf32> to vector<8x384xf32>
    %42 = arith.mulf %39, %41 : vector<8x384xf32>
    %c0_34 = arith.constant 0 : index
    %c0_35 = arith.constant 0 : index
    %43 = vector.load %arg4[%c0_34, %c0_35] : memref<8x1xf32, #tpu.memory_space<vmem>>, vector<8x1xf32>
    %44 = vector.broadcast %43 : vector<8x1xf32> to vector<8x384xf32>
    %45 = arith.addf %42, %44 : vector<8x384xf32>
    %cst_36 = arith.constant 1.000000e-01 : f32
    %46 = vector.broadcast %cst_36 : f32 to vector<8x384xf32>
    %47 = arith.mulf %46, %45 : vector<8x384xf32>
    %48 = arith.maximumf %45, %47 : vector<8x384xf32>
    %49 = arith.truncf %48 : vector<8x384xf32> to vector<8x384xbf16>
    %c0_37 = arith.constant 0 : index
    %c0_38 = arith.constant 0 : index
    %c0_39 = arith.constant 0 : index
    %50 = vector.load %arg5[%c0_37, %c0_38, %c0_39] : memref<1x8x384xbf16, #tpu.memory_space<vmem>>, vector<1x8x384xbf16>
    %51 = vector.shape_cast %50 : vector<1x8x384xbf16> to vector<8x384xbf16>
    %52 = vector.shape_cast %49 : vector<8x384xbf16> to vector<1x8x384xbf16>
    tpu.vector_store %arg5[%c0_37, %c0_38, %c0_39], %52 {strides = array<i32>} : memref<1x8x384xbf16, #tpu.memory_space<vmem>>, vector<1x8x384xbf16>,
    return
  }
  func.func @transform_0(%arg0: i32) -> (i32, i32, i32) {
    %c0_i32 = arith.constant 0 : i32
    %c0_i32_0 = arith.constant 0 : i32
    %c0_i32_1 = arith.constant 0 : i32
    return %arg0, %c0_i32, %c0_i32_0 : i32, i32, i32
  }
  func.func @transform_1(%arg0: i32) -> (i32, i32) {
    %c0_i32 = arith.constant 0 : i32
    %c0_i32_0 = arith.constant 0 : i32
    %c0_i32_1 = arith.constant 0 : i32
    return %c0_i32, %c0_i32_0 : i32, i32
  }
  func.func @transform_2(%arg0: i32) -> (i32, i32) {
    %c0_i32 = arith.constant 0 : i32
    %c0_i32_0 = arith.constant 0 : i32
    %c0_i32_1 = arith.constant 0 : i32
    return %c0_i32, %c0_i32_0 : i32, i32
  }
  func.func @transform_3(%arg0: i32) -> (i32, i32) {
    %c0_i32 = arith.constant 0 : i32
    %c0_i32_0 = arith.constant 0 : i32
    %c0_i32_1 = arith.constant 0 : i32
    return %c0_i32, %c0_i32_0 : i32, i32
  }
  func.func @transform_4(%arg0: i32) -> (i32, i32, i32) {
    %c0_i32 = arith.constant 0 : i32
    %c0_i32_0 = arith.constant 0 : i32
    %c0_i32_1 = arith.constant 0 : i32
    return %arg0, %c0_i32, %c0_i32_0 : i32, i32, i32
  }
}

</mosaic_0001>

<bundles_post_ra>
// kernel: tpu_custom_call.1
= control target key start
LH: loop header
LB: loop body
LE: loop exit
PB: predicated region body
PF: predicated region fallthrough
CT: control target
= control target key end

     0   :  { %9 = vsyncpa [#allocation4], 0  ;;  %s1148_s0 = inlined_call_operand.hbm [shape: bf16[2,8,512], index: 0, kind: input, shape index: {}]   ;;  %s1149_s1 = inlined_call_operand.vmem [shape: bf16[8,72], index: 1, kind: input, shape index: {}]   ;;  %s1150_s2 = inlined_call_operand.vmem [shape: f32[8,1], index: 2, kind: input, shape index: {}]   ;;  %s1151_s3 = inlined_call_operand.vmem [shape: f32[8,1], index: 3, kind: input, shape index: {}]   ;;  %s1152_s4 = inlined_call_operand.hbm [shape: bf16[2,8,384], index: 4, kind: output, shape index: {}]  }
   0x1   :  { %11 = vsyncpa [#allocation4 + $0x1], 0 }
   0x2   :  { %12 = vsyncpa [#allocation5], 0 }
   0x3   :  { %14 = vsyncpa [#allocation5 + $0x1], 0  ;;  %s947_s15 = smov 0   ;;  %s949_s16 = smov 0  }
   0x4   :  { %s951_s17 = smov 0   ;;  %s953_s18 = smov 0  }
   0x5 LB: > { %s968_s19 = sadd.s32 4294967295, %s911_s18   ;;  %s660_s20 = sadd.s32 4294967294, %s911_s18   ;;  %s911_s18 = sphi %s953_s18, %s1162_s18   ;;  %s907_s17 = sphi %s951_s17, %s1161_s17   ;;  %s903_s16 = sphi %s949_s16, %s1160_s16   ;;  %s899_s15 = sphi %s947_s15, %s1159_s15  }
   0x6   : > { %s972_s21 = sadd.s32 1, %s911_s18   ;;  %s27_s22 = sadd.s32 1, %s907_s17 }
   0x7   : > { %s24_s23 = ssub.s32 %s911_s18, %s972_s21  ;;  %p34_p0 = scmp.ne.s32.totalorder %s907_s17, %s903_s16 }
   0x8   : > { %p25_p1 = scmp.eq.s32.totalorder %s24_s23, 0  ;;  %p35_p2 = scmp.eq.s32.totalorder %s911_s18, 0 }
   0x9   : > { %p40_p3 = scmp.ne.s32.totalorder %s903_s16, %s899_s15  ;;  %p41_p4 = scmp.eq.s32.totalorder %s968_s19, 0 }
   0xa   : > { %s984_s24 = scalar_select %p25_p1, %s907_s17, %s27_s22  }
   0xb   : > { %p986_p5 = por %p35_p2, %p34_p0  ;;  %p990_p6 = por %p41_p4, %p40_p3 }
   0xc   : > { %p127_p7 = scmp.eq.s32.totalorder %s968_s19, 1  ;;  %p133_p8 = scmp.eq.s32.totalorder %s660_s20, 1 }
   0xd   : > { %p689_p10 = scmp.lt.s32.totalorder %s911_s18, 2  ;;  %s162_s29 = sand.u32 1, %s907_s17  }
   0xe   : > { %p997_p11 = por %p127_p7, %p34_p0  ;;  %p1001_p12 = por %p133_p8, %p40_p3 }
   0xf   : > { %s674_s30 = sshll.u32 %s911_s18, 4  ;;  %s663_s5 = sshll.u32 %s162_s29, 4 }
  0x10   : > { %s171_s8 = scalar_lea.hbm %s1148_s0, %s674_s30  ;;  %s166_s10 = scalar_lea.vmem [#allocation3], %s663_s5 }
  0x11   : > { %s173_s9 = sshll.u32 %s171_s8, 4  ;;  %s175_s11 = sshll.u32 %s166_s10, 4  ;;  %s174_s9 = int_to_ptr.hbm [resolvable:$true] %s173_s9  ;;  %s176_s11 = int_to_ptr.vmem [resolvable:$true] %s175_s11 }
  0x12   : > { %p1012_p13 = pnand %p689_p10, %p986_p5  ;;  %p666_p0 = scmp.ge.s32.totalorder %s911_s18, 1 }
  0x13   : > { %p180_p1 = scmp.lt.s32.totalorder %s911_s18, 3  ;;  %s163_s13 = scalar_lea.sflag [#allocation4], %s162_s29 }
  0x14   : > { %s815_s14 = sshra.s32 %s174_s9, 4  ;;  %p819_p3 = pneg %p1012_p13  ;;  %s816_s14 = int_to_ptr.hbm [resolvable:$true] %s815_s14 }
  0x15   : > { %s817_s20 = scalar_lea.hbm %s816_s14, 16  ;;  %s822_s25 = scalar_lea.hbm %s1148_s0, 32 }
  0x16   : > { %p818_p2 = scmp.ne.s32.totalorder %s816_s14, %s817_s20  ;;  %p823_p5 = scmp.lt.s32.totalorder %s816_s14, %s1148_s0 }
  0x17   : > { %p824_p8 = scmp.lt.s32.totalorder %s822_s25, %s817_s20 }
  0x18   : > { %p820_p4 = pnand %p819_p3, %p818_p2 }
  0x19   : > { %p825_p10 = por %p824_p8, %p823_p5 }
  0x1a   : > { %p821_p7 = pneg %p820_p4 }
  0x1c   : > { %p826_p9 = pnand %p825_p10, %p821_p7 }
  0x1e   : > { %829 = shalt.err (!%p826_p9)
}
  0x1f   : > { %684 = dma.hbm_to_vmem [thread:$0]  (!%p1012_p13), %s174_s9, 256, %s176_s11, %s163_s13  }
  0x20   : > { %p181_p2 = pnand %p666_p0, %p180_p1 }
  0x21   : > { %s1033_s29 = sand.u32 (!%p181_p2), 1, %s903_s16  }
  0x22   : > { %184 = sbr.rel (%p181_p2) target bundleno = 347 (0x15b), region = 36  ;;  %s667_s6 = sshll.u32 (!%p181_p2), %s1033_s29, 4 }
  0x23   : > { %s187_s7 = scalar_lea.sflag (!%p181_p2), [#allocation4], %s1033_s29  ;;  %s1037_s8 = scalar_lea.vmem (!%p181_p2), [#allocation3], %s667_s6 }
  0x27   : > { %890 = dma.done.wait (%p990_p6), %s187_s7, 256  }
  0x28   : > { %892 = vsyncadd (%p990_p6), %s187_s7, 4294967040  ;;  %v422_v0 = vld [vmem:[%s1037_s8 + $0x8] sm:$0xff]  ;;  %v1045_v3 = vld [vmem:[%s1037_s8] sm:$0xff]  ;;  %s913_s9 = smov 90   ;;  %s914_s10 = smov 91   ;;  %vm439_vm0 = vcmask 736256  }
  0x29   : > { %v425_v1 = vunpack.c.l.bf16 %v422_v0  ;;  %v426_v2 = vunpack.c.h.bf16 %v422_v0  ;;  %v423_v5 = vunpack.c.l.bf16 %v1045_v3  ;;  %v424_v6 = vunpack.c.h.bf16 %v1045_v3  ;;  %s915_s11 = smov 109   ;;  %s916_s26 = smov 92   ;;  %v545_v48 = vld [vmem:[%s1150_s2] sm:$0xff] }
  0x2a   : > { %s917_s12 = smov 108   ;;  %s918_s13 = smov 126   ;;  %vm496_vm1 = vcmask 1043456   ;;  %vm383_vm2 = vcmask 752640   ;;  %vm411_vm3 = vcmask 744448   ;;  %vm327_vm4 = vcmask 891904  }
  0x2b   : > { %v732_v4 = vpack.i.bf16 %v426_v2, %v425_v1  ;;  %v747_v7 = vpack.i.bf16 %v424_v6, %v423_v5  ;;  %s919_s14 = smov 110   ;;  %s920_s20 = smov 127   ;;  %vm355_vm5 = vcmask 883712   ;;  %v554_v49 = vld [vmem:[%s1151_s3] sm:$0xff]  ;;  %v921_v55 = vmov 0  }
  0x2c   : > { %812 = vset.pattern.permute.xlu1 %v921_v55  ;;  %813 = vset.pattern.permute.xlu2 %v921_v55  ;;  %vm271_vm6 = vcmask 1031168   ;;  %vm299_vm7 = vcmask 900096   ;;  %vm243_vm8 = vcmask 1039360   ;;  %vm492_vm9 = vcmask 588800   ;;  %s675_s7 = smul.u32 12, %s1033_s29  ;;  %s865_s25 = scalar_lea.hbm %s1152_s4, 24 }
  0x2d   : > { %733 = vrot.lane.b32.xlu0 %v732_v4, %s913_s9  ;;  %743 = vrot.lane.b32.xlu1 %v732_v4, %s914_s10 }
  0x2e   : > { %753 = vrot.lane.b32.xlu2 %v732_v4, %s915_s11  ;;  %814 = vset.pattern.permute.xlu0 %v921_v55 }
  0x35   : > { %748 = vrot.lane.b32.xlu1 %v747_v7, %s913_s9  ;;  %738 = vrot.lane.b32.xlu0 %v732_v4, %s916_s26 }
  0x36   : > { %758 = vrot.lane.b32.xlu2 %v732_v4, %s917_s12 }
  0x3d   : > { %768 = vrot.lane.b32.xlu1 %v747_v7, %s914_s10  ;;  %763 = vrot.lane.b32.xlu0 %v747_v7, %s916_s26  ;;  %s215_s26 = scalar_lea.vmem [#allocation6], %s675_s7 }
  0x3e   : > { %773 = vrot.lane.b32.xlu2 %v732_v4, %s918_s13 }
  0x45   : > { %783 = vrot.lane.b32.xlu1 %v747_v7, %s915_s11  ;;  %778 = vrot.lane.b32.xlu0 %v732_v4, %s919_s14 }
  0x46   : > { %788 = vrot.lane.b32.xlu2 %v747_v7, %s917_s12  ;;  %s587_s12 = sshll.u32 %s215_s26, 4  ;;  %s588_s12 = int_to_ptr.vmem [resolvable:$true] %s587_s12 }
  0x4d   : > { %798 = vrot.lane.b32.xlu1 %v747_v7, %s918_s13  ;;  %793 = vrot.lane.b32.xlu0 %v732_v4, %s920_s20  ;;  %s574_s13 = scalar_lea.sflag [#allocation5], %s1033_s29 }
  0x4e   : > { %803 = vrot.lane.b32.xlu2 %v747_v7, %s919_s14 }
  0x55   : > { %808 = vrot.lane.b32.xlu0 %v747_v7, %s920_s20  ;;  %548 = vperm.xlu1 %812, %v545_v48  }
  0x56   : > { %557 = vperm.xlu2 %813, %v554_v49  }
  0x88   : > { %v1053_v8 = vpop.permute.xlu2 %753 }
  0x89   : > { %v756_v19 = vunpack.i.h.bf16 %v1053_v8  ;;  %v755_v20 = vunpack.i.l.bf16 %v1053_v8 }
  0x8b   : > { %v330_v37 = vsel %vm327_vm4, %v755_v20, %v756_v19 }
  0x90   : > { %v1055_v9 = vpop.permute.xlu2 %758 }
  0x91   : > { %v761_v21 = vunpack.i.h.bf16 %v1055_v9  ;;  %v760_v22 = vunpack.i.l.bf16 %v1055_v9 }
  0x93   : > { %v358_v38 = vsel %vm355_vm5, %v760_v22, %v761_v21  ;;  %v218_v21 = vld [vmem:[%s1037_s8 + $0x8] sm:$0xf]  ;;  %s676_s8 = smul.u32 12, %s968_s19 }
  0x94   : > { %v485_v43 = vpack.c.bf16 %v358_v38, %v330_v37 }
  0x95   : > { %s585_s11 = scalar_lea.hbm %s1152_s4, %s676_s8 }
  0x96   : > { %s589_s19 = sshll.u32 %s585_s11, 4  ;;  %s590_s19 = int_to_ptr.hbm [resolvable:$true] %s589_s19 }
  0x97   : > { %s859_s14 = sshra.s32 %s590_s19, 4  ;;  %s860_s14 = int_to_ptr.hbm [resolvable:$true] %s859_s14 }
  0x98   : > { %v1063_v25 = vpop.permute.xlu2 %773  ;;  %s861_s20 = scalar_lea.hbm %s860_s14, 12  ;;  %p866_p0 = scmp.lt.s32.totalorder %s860_s14, %s1152_s4 }
  0x99   : > { %v776_v59 = vunpack.i.h.bf16 %v1063_v25  ;;  %v775_v60 = vunpack.i.l.bf16 %v1063_v25  ;;  %p862_p6 = scmp.ne.s32.totalorder %s860_s14, %s861_s20  ;;  %p867_p1 = scmp.lt.s32.totalorder %s865_s25, %s861_s20 }
  0x9b   : > { %p863_p9 = pnand %p862_p6, %p997_p11  ;;  %p868_p3 = por %p867_p1, %p866_p0 }
  0x9d   : > { %p864_p13 = pneg %p863_p9 }
  0x9f   : > { %v734_v10 = vpop.permute.xlu0 %733  ;;  %v744_v11 = vpop.permute.xlu1 %743  ;;  %p869_p4 = pnand %p868_p3, %p864_p13 }
  0xa0   : > { %v736_v12 = vunpack.i.h.bf16 %v734_v10  ;;  %v735_v13 = vunpack.i.l.bf16 %v734_v10  ;;  %v746_v17 = vunpack.i.h.bf16 %v744_v11  ;;  %v745_v18 = vunpack.i.l.bf16 %v744_v11  ;;  %v789_v50 = vpop.permute.xlu2 %788 }
  0xa1   : > { %v790_v56 = vunpack.i.l.bf16 %v789_v50  ;;  %v791_v61 = vunpack.i.h.bf16 %v789_v50  ;;  %v274_v10 = vsel %vm271_vm6, %v775_v60, %v776_v59 }
  0xa2   : > { %v442_v14 = vsel %vm439_vm0, %v735_v13, %v736_v12  ;;  %v414_v31 = vsel %vm411_vm3, %v745_v18, %v746_v17 }
  0xa3   : > { %v491_v15 = vpack.c.bf16 %v442_v14, %v442_v14  ;;  %v356_v0 = vsel %vm355_vm5, %v790_v56, %v791_v61 }
  0xa5   : > { %v504_v16 = vsel %vm496_vm1, %v491_v15, 0 }
  0xa6   : > { %535 = vmatpush.bf16.msra.mxu2 %v504_v16 }
  0xa7   : > { %v749_v23 = vpop.permute.xlu1 %748  ;;  %v739_v24 = vpop.permute.xlu0 %738 }
  0xa8   : > { %v751_v26 = vunpack.i.h.bf16 %v749_v23  ;;  %v750_v27 = vunpack.i.l.bf16 %v749_v23  ;;  %v741_v28 = vunpack.i.h.bf16 %v739_v24  ;;  %v740_v29 = vunpack.i.l.bf16 %v739_v24  ;;  %v804_v11 = vpop.permute.xlu2 %803 }
  0xa9   : > { %v805_v16 = vunpack.i.l.bf16 %v804_v11  ;;  %v806_v23 = vunpack.i.h.bf16 %v804_v11 }
  0xaa   : > { %v386_v30 = vsel %vm383_vm2, %v740_v29, %v741_v28  ;;  %v441_v32 = vsel %vm439_vm0, %v751_v26, %v735_v13  ;;  %v440_v33 = vsel %vm439_vm0, %v750_v27, %v751_v26  ;;  %v357_v13 = vsel %vm355_vm5, %v791_v61, %v760_v22 }
  0xab   : > { %v488_v34 = vpack.c.bf16 %v414_v31, %v386_v30  ;;  %v490_v35 = vpack.c.bf16 %v441_v32, %v441_v32  ;;  %v489_v36 = vpack.c.bf16 %v440_v33, %v440_v33  ;;  %v300_v9 = vsel %vm299_vm7, %v805_v16, %v806_v23 }
  0xad   : > { %536 = vmatpush.bf16.msra.mxu2 %v488_v34  ;;  %v501_v39 = vsel %vm496_vm1, %v490_v35, 0  ;;  %v498_v40 = vsel %vm496_vm1, %v489_v36, 0  ;;  %v449_v35 = vld [vmem:[%s1149_s1] sm:$0xf] }
  0xae   : > { %522 = vmatpush.bf16.msra.mxu1 %v501_v39  ;;  %509 = vmatpush.bf16.msra.mxu0 %v498_v40 }
  0xaf   : > { %v769_v41 = vpop.permute.xlu1 %768  ;;  %v764_v42 = vpop.permute.xlu0 %763 }
  0xb0   : > { %v771_v44 = vunpack.i.h.bf16 %v769_v41  ;;  %v770_v45 = vunpack.i.l.bf16 %v769_v41  ;;  %v766_v46 = vunpack.i.h.bf16 %v764_v42  ;;  %v765_v47 = vunpack.i.l.bf16 %v764_v42 }
  0xb1   : > { %537 = vmatpush.bf16.msra.mxu2 %v485_v43 }
  0xb2   : > { %v384_v51 = vsel %vm383_vm2, %v765_v47, %v766_v46  ;;  %v412_v52 = vsel %vm411_vm3, %v770_v45, %v771_v44  ;;  %v385_v53 = vsel %vm383_vm2, %v766_v46, %v740_v29  ;;  %v413_v54 = vsel %vm411_vm3, %v771_v44, %v745_v18  ;;  %v558_v45 = vpop.permute.xlu2 %557 }
  0xb3   : > { %v486_v57 = vpack.c.bf16 %v412_v52, %v384_v51  ;;  %v487_v58 = vpack.c.bf16 %v413_v54, %v385_v53 }
  0xb5   : > { %510 = vmatpush.bf16.msra.mxu0 %v486_v57  ;;  %523 = vmatpush.bf16.msra.mxu1 %v487_v58 }
  0xb7   : > { %v784_v62 = vpop.permute.xlu1 %783  ;;  %v779_v63 = vpop.permute.xlu0 %778 }
  0xb8   : > { %v786_v1 = vunpack.i.h.bf16 %v784_v62  ;;  %v785_v2 = vunpack.i.l.bf16 %v784_v62  ;;  %v781_v4 = vunpack.i.h.bf16 %v779_v63  ;;  %v780_v7 = vunpack.i.l.bf16 %v779_v63 }
  0xba   : > { %v329_v12 = vsel %vm327_vm4, %v786_v1, %v755_v20  ;;  %v302_v14 = vsel %vm299_vm7, %v780_v7, %v781_v4  ;;  %v328_v15 = vsel %vm327_vm4, %v785_v2, %v786_v1  ;;  %v221_v20 = vunpack.c.l.bf16 %v218_v21 }
  0xbb   : > { %v484_v17 = vpack.c.bf16 %v357_v13, %v329_v12  ;;  %v482_v18 = vpack.c.bf16 %v302_v14, %v274_v10  ;;  %v483_v19 = vpack.c.bf16 %v356_v0, %v328_v15  ;;  %v301_v29 = vsel %vm299_vm7, %v806_v23, %v780_v7 }
  0xbd   : > { %524 = vmatpush.bf16.msra.mxu1 %v484_v17  ;;  %538 = vmatpush.bf16.msra.mxu2 %v482_v18 }
  0xbe   : > { %511 = vmatpush.bf16.msra.mxu0 %v483_v19 }
  0xbf   : > { %v799_v8 = vpop.permute.xlu1 %798  ;;  %v794_v24 = vpop.permute.xlu0 %793 }
  0xc0   : > { %v801_v22 = vunpack.i.h.bf16 %v799_v8  ;;  %v800_v25 = vunpack.i.l.bf16 %v799_v8  ;;  %v796_v26 = vunpack.i.h.bf16 %v794_v24  ;;  %v795_v27 = vunpack.i.l.bf16 %v794_v24 }
  0xc2   : > { %v273_v28 = vsel %vm271_vm6, %v801_v22, %v775_v60  ;;  %v246_v30 = vsel %vm243_vm8, %v795_v27, %v796_v26  ;;  %v272_v31 = vsel %vm271_vm6, %v800_v25, %v801_v22 }
  0xc3   : > { %v481_v32 = vpack.c.bf16 %v301_v29, %v273_v28  ;;  %v479_v33 = vpack.c.bf16 %v246_v30, %v221_v20  ;;  %v480_v34 = vpack.c.bf16 %v300_v9, %v272_v31 }
  0xc5   : > { %525 = vmatpush.bf16.msra.mxu1 %v481_v32  ;;  %539 = vmatpush.bf16.msra.mxu2 %v479_v33 }
  0xc6   : > { %512 = vmatpush.bf16.msra.mxu0 %v480_v34 }
  0xc7   : > { %v809_v36 = vpop.permute.xlu0 %808  ;;  %v549_v43 = vpop.permute.xlu1 %548 }
  0xc8   : > { %v811_v37 = vunpack.i.h.bf16 %v809_v36  ;;  %v810_v38 = vunpack.i.l.bf16 %v809_v36  ;;  %670 = vmatmul.msk.bf16.vlgmr.msra.gmra.mxu2 %vm492_vm9, %v449_v35 }
  0xca   : > { %v244_v39 = vsel %vm243_vm8, %v810_v38, %v811_v37  ;;  %v245_v40 = vsel %vm243_vm8, %v811_v37, %v795_v27 }
  0xcb   : > { %v477_v41 = vpack.c.bf16 %v244_v39, %v423_v5  ;;  %v478_v42 = vpack.c.bf16 %v245_v40, %v424_v6 }
  0xcd   : > { %513 = vmatpush.bf16.msra.mxu0 %v477_v41  ;;  %526 = vmatpush.bf16.msra.mxu1 %v478_v42 }
  0xd0   : > { %668 = vmatmul.msk.bf16.vlgmr.msra.gmra.mxu0 %vm492_vm9, %v449_v35  ;;  %669 = vmatmul.msk.bf16.vlgmr.msra.gmra.mxu1 %vm492_vm9, %v449_v35 }
 0x14b   : > { %v541_v44 = vpop.f32.mrf.mxu2 }
 0x14c   : > { %v553_v46 = vmul.f32 %v549_v43, %v541_v44 }
 0x14d   : > { %v515_v47 = vpop.f32.mrf.mxu0  ;;  %v528_v48 = vpop.f32.mrf.mxu1 }
 0x14e   : > { %v562_v49 = vadd.f32 %v558_v45, %v553_v46  ;;  %v551_v50 = vmul.f32 %v549_v43, %v515_v47  ;;  %v552_v51 = vmul.f32 %v549_v43, %v528_v48 }
 0x150   : > { %v565_v52 = vmul.f32 0.1, %v562_v49  ;;  %v560_v5 = vadd.f32 %v558_v45, %v551_v50  ;;  %v561_v53 = vadd.f32 %v558_v45, %v552_v51 }
 0x152   : > { %v568_v3 = vmax.f32 %v562_v49, %v565_v52  ;;  %v563_v6 = vmul.f32 0.1, %v560_v5  ;;  %v564_v54 = vmul.f32 0.1, %v561_v53 }
 0x153   : > { %v543_v55 = vpop.f32.mrf.mxu2 }
 0x154   : > { %v570_v56 = vpack.c.bf16 %v568_v3, %v568_v3  ;;  %v566_v57 = vmax.f32 %v560_v5, %v563_v6  ;;  %v567_v58 = vmax.f32 %v561_v53, %v564_v54 }
 0x155   : > { %v517_v59 = vpop.f32.mrf.mxu0  ;;  %v530_v60 = vpop.f32.mrf.mxu1 }
 0x156   : > { %v569_v61 = vpack.c.bf16 %v567_v58, %v566_v57  ;;  %572 = vst [vmem:[%s215_s26 + $0x8] sm:$0xf] %v570_v56 }
 0x158   : > { %571 = vst [vmem:[%s215_s26] sm:$0xff] %v569_v61 }
 0x159   : > { %872 = shalt.err (!%p869_p4)
}
 0x15a   : > { %679 = dma.vmem_to_hbm [thread:$0]  (%p997_p11), %s588_s12, 192, %s590_s19, %s574_s13  }
 0x15b PF: > { %s601_s29 = sand.u32 1, %s899_s15   ;;  %p1158_p7 = scmp.ge.s32.totalorder %s911_s18, 2 }
 0x15c   : > { %s602_s6 = scalar_lea.sflag [#allocation5], %s601_s29 }
 0x15d   : > { %p686_p5 = pnand %p1158_p7, %p1001_p12 }
 0x15f   : > { %p687_p8 = pneg %p686_p5 }
 0x161   : > { %894 = dma.done.wait (%p687_p8), %s602_s6, 192  }
 0x162   : > { %896 = vsyncadd (%p687_p8), %s602_s6, 4294967104  ;;  %p17_p10 = scmp.ge.s32.totalorder %s972_s21, 4   ;;  %s1159_s15 = smov %s903_s16 }
 0x163   : > { %s1160_s16 = smov %s907_s17  ;;  %s1161_s17 = smov %s984_s24 }
 0x164   : > { %s1162_s18 = smov %s972_s21  ;;  %19 = sbr.rel (!%p17_p10) target bundleno = 5 (0x5), region = 81 }
 0x169   :  { %608 = vsyncpa [#allocation4], 1 }
 0x16a   :  { %610 = vsyncpa [#allocation4 + $0x1], 1 }
 0x16b   :  { %611 = vsyncpa [#allocation5], 1 }
 0x16c   :  { %613 = vsyncpa [#allocation5 + $0x1], 1 }

</bundles_post_ra>
